<compile_context>
chip_gen: v5e
topology: v5e:2x2
jax: 0.10.0
libtpu: 0.0.40
codegen_flags: <defaults>
</compile_context>

<pallas_src>
import math

import jax
import jax.numpy as jnp
from jax.experimental import pallas as pl
from jax.experimental.pallas import tpu as pltpu


def _round_up(a: int, m: int) -> int:
    return ((a + m - 1) // m) * m


def _mtlr_kernel(x_ref, w_ref, b_ref, out_ref, acc_ref):
    # grid = (N_tiles, K_tiles); axis 1 is the contraction (F) axis.
    k = pl.program_id(1)

    @pl.when(k == 0)
    def _():
        acc_ref[...] = jnp.zeros_like(acc_ref)

    acc_ref[...] += jnp.dot(
        x_ref[...], w_ref[...], preferred_element_type=jnp.float32
    )

    @pl.when(k == pl.num_programs(1) - 1)
    def _():
        # Bias broadcast only once, in the finalize branch.
        out_ref[...] = (acc_ref[...] + b_ref[...]).astype(out_ref.dtype)


def mtlr_forward(x, weight, bias, G, *, tm_max: int = 512, tk_max: int = 512):
    """x: (N, F) f32; weight: (F, K) f32; bias: (K,) f32; G: (K, K+1) f32.

    Returns (N, K+1) f32, identical math to (x @ weight + bias) @ G.
    """
    x = x.astype(jnp.float32)
    N, F = x.shape
    K1 = G.shape[1]  # K + 1

    # ---- Fold the tril(ones) matmul into the weights (outside the kernel). ----
    w_folded = jnp.dot(weight.astype(jnp.float32), G.astype(jnp.float32))  # (F, K1)
    b_folded = jnp.dot(bias.astype(jnp.float32), G.astype(jnp.float32))    # (K1,)

    # ---- Lane-dense output: pad output width up to a multiple of 128. ----
    TN = _round_up(K1, 128)
    w_p = jnp.pad(w_folded, ((0, 0), (0, TN - K1)))          # (F, TN)
    b_p = jnp.pad(b_folded, (0, TN - K1)).reshape(1, TN)     # (1, TN)

    # ---- Tile selection (portable across v5e / v6e / v7x VMEM budgets). ----
    # Contraction (F) tiling: full-F block if small, otherwise 128-aligned.
    if F < 128:
        F_pad, tk = F, F                       # block == full dim is allowed
    else:
        F_pad = _round_up(F, 128)
        tk = F_pad
        if F_pad > tk_max:
            tk = next(t for t in (512, 384, 256, 128) if F_pad % t == 0)

    # Row (N) tiling: multiple of 8 sublanes, capped at tm_max.
    N_pad8 = _round_up(N, 8)
    tm = min(tm_max, N_pad8)
    N_pad = _round_up(N_pad8, tm)

    # Zero-pad x; extra rows/cols contribute nothing and are sliced away.
    x_p = jnp.pad(x, ((0, N_pad - N), (0, F_pad - F)))
    if w_p.shape[0] != F_pad:
        w_p = jnp.pad(w_p, ((0, F_pad - F), (0, 0)))

    grid = (N_pad // tm, F_pad // tk)

    cost = pl.CostEstimate(
        flops=2 * N_pad * F_pad * TN,
        transcendentals=0,
        bytes_accessed=4 * (N_pad * F_pad + F_pad * TN + N_pad * TN),
    )

    out_padded = pl.pallas_call(
        _mtlr_kernel,
        out_shape=jax.ShapeDtypeStruct((N_pad, TN), jnp.float32),
        grid_spec=pltpu.PrefetchScalarGridSpec(
            num_scalar_prefetch=0,
            grid=grid,
            in_specs=[
                pl.BlockSpec((tm, tk), lambda i, k: (i, k)),   # x tile
                pl.BlockSpec((tk, TN), lambda i, k: (k, 0)),   # W' tile
                pl.BlockSpec((1, TN), lambda i, k: (0, 0)),    # b' (broadcast)
            ],
            out_specs=pl.BlockSpec((tm, TN), lambda i, k: (i, 0)),
            scratch_shapes=[pltpu.VMEM((tm, TN), jnp.float32)],
        ),
        compiler_params=pltpu.CompilerParams(
            dimension_semantics=("parallel", "arbitrary"),
            vmem_limit_bytes=32 * 1024 * 1024,
        ),
        cost_estimate=cost,
    )(x_p, w_p, b_p)

    return out_padded[:N, :K1]


def init_mtlr_params(key, in_features, num_time_bins):
    """Deterministic parameter init matching the PyTorch module's __init__.

    PyTorch: self.num_time_bins = num_time_bins + 1
             mtlr_weight: (in_features, K)  with K = num_time_bins  (xavier_normal_)
             mtlr_bias:   (K,)              -> zeros
             G:           tril(ones(K, K+1))
    """
    K = num_time_bins
    std = math.sqrt(2.0 / (in_features + K))
    weight = std * jax.random.normal(key, (in_features, K), dtype=jnp.float32)
    bias = jnp.zeros((K,), dtype=jnp.float32)
    G = jnp.tril(jnp.ones((K, K + 1), dtype=jnp.float32))
    return weight, bias, G


if __name__ == "__main__":
    # Small shapes consistent with the module: batch=2, in_features=32,
    # num_time_bins (constructor arg) = 8  ->  K = 8, output width = 9.
    batch = 2
    in_features = 32
    num_time_bins = 8

    key = jax.random.PRNGKey(0)
    kx, kw = jax.random.split(key)

    x = jax.random.normal(kx, (batch, in_features), dtype=jnp.float32)
    weight, bias, G = init_mtlr_params(kw, in_features, num_time_bins)

    out = mtlr_forward(x, weight, bias, G)
    out = jax.block_until_ready(out)

    # Reference check in plain JAX (same math as the PyTorch forward).
    ref = (x @ weight + bias) @ G
    assert out.shape == (batch, num_time_bins + 1), out.shape
    assert jnp.allclose(out, ref, atol=1e-5, rtol=1e-5), "mismatch vs reference"

    print("KERNEL_OK")
</pallas_src>

<mosaic_0001>
module attributes {stable_mosaic.version = 11 : i64} {
  func.func @_mtlr_kernel(%arg0: i32, %arg1: i32, %arg2: memref<8x32xf32, #tpu.memory_space<vmem>>, %arg3: memref<32x128xf32, #tpu.memory_space<vmem>>, %arg4: memref<1x128xf32, #tpu.memory_space<vmem>>, %arg5: memref<8x128xf32, #tpu.memory_space<vmem>>, %arg6: memref<8x128xf32, #tpu.memory_space<vmem>>) attributes {dimension_semantics = [#tpu.dimension_semantics<parallel>, #tpu.dimension_semantics<arbitrary>], iteration_bounds = array<i64: 1, 1>, scalar_prefetch = 0 : i64, scratch_operands = 1 : i64, tpu.core_type = #tpu.core_type<tc>, window_params = [{transform_indices = @transform_0, window_bounds = array<i64: 8, 32>}, {transform_indices = @transform_1, window_bounds = array<i64: 32, 128>}, {pipeline_mode = #tpu.pipeline_mode<synchronous>, transform_indices = @transform_2, window_bounds = array<i64: 1, 128>}, {transform_indices = @transform_3, window_bounds = array<i64: 8, 128>}]} {
    %c0_i32 = arith.constant 0 : i32
    %0 = arith.cmpi eq, %arg1, %c0_i32 : i32
    %1 = arith.extui %0 : i1 to i32
    %c0_i32_0 = arith.constant 0 : i32
    %2 = arith.cmpi ne, %1, %c0_i32_0 : i32
    scf.if %2 {
      %cst_10 = arith.constant 0.000000e+00 : f32
      %12 = vector.broadcast %cst_10 : f32 to vector<8x128xf32>
      %c0_11 = arith.constant 0 : index
      %c0_12 = arith.constant 0 : index
      %13 = vector.load %arg6[%c0_11, %c0_12] : memref<8x128xf32, #tpu.memory_space<vmem>>, vector<8x128xf32>
      tpu.vector_store %arg6[%c0_11, %c0_12], %12 {strides = array<i32>} : memref<8x128xf32, #tpu.memory_space<vmem>>, vector<8x128xf32>,
    } else {
    }
    %c0 = arith.constant 0 : index
    %c0_1 = arith.constant 0 : index
    %3 = vector.load %arg6[%c0, %c0_1] : memref<8x128xf32, #tpu.memory_space<vmem>>, vector<8x128xf32>
    %c0_2 = arith.constant 0 : index
    %c0_3 = arith.constant 0 : index
    %4 = vector.load %arg2[%c0_2, %c0_3] : memref<8x32xf32, #tpu.memory_space<vmem>>, vector<8x32xf32>
    %c0_4 = arith.constant 0 : index
    %c0_5 = arith.constant 0 : index
    %5 = vector.load %arg3[%c0_4, %c0_5] : memref<32x128xf32, #tpu.memory_space<vmem>>, vector<32x128xf32>
    %cst = arith.constant dense<0.000000e+00> : vector<8x128xf32>
    %6 = tpu.matmul %4, %5, %cst {dimension_numbers = #tpu.dot_dimension_numbers<[1], [0], [0], [1], [0, 0, 1, 1], [], []>} : vector<8x32xf32>, vector<32x128xf32>, vector<8x128xf32> -> vector<8x128xf32>
    %7 = arith.addf %3, %6 : vector<8x128xf32>
    %c0_6 = arith.constant 0 : index
    %c0_7 = arith.constant 0 : index
    %8 = vector.load %arg6[%c0_6, %c0_7] : memref<8x128xf32, #tpu.memory_space<vmem>>, vector<8x128xf32>
    tpu.vector_store %arg6[%c0_6, %c0_7], %7 {strides = array<i32>} : memref<8x128xf32, #tpu.memory_space<vmem>>, vector<8x128xf32>,
    %c0_i32_8 = arith.constant 0 : i32
    %9 = arith.cmpi eq, %arg1, %c0_i32_8 : i32
    %10 = arith.extui %9 : i1 to i32
    %c0_i32_9 = arith.constant 0 : i32
    %11 = arith.cmpi ne, %10, %c0_i32_9 : i32
    scf.if %11 {
      %c0_10 = arith.constant 0 : index
      %c0_11 = arith.constant 0 : index
      %12 = vector.load %arg6[%c0_10, %c0_11] : memref<8x128xf32, #tpu.memory_space<vmem>>, vector<8x128xf32>
      %c0_12 = arith.constant 0 : index
      %c0_13 = arith.constant 0 : index
      %13 = vector.load %arg4[%c0_12, %c0_13] : memref<1x128xf32, #tpu.memory_space<vmem>>, vector<1x128xf32>
      %14 = vector.broadcast %13 : vector<1x128xf32> to vector<8x128xf32>
      %15 = arith.addf %12, %14 : vector<8x128xf32>
      %c0_14 = arith.constant 0 : index
      %c0_15 = arith.constant 0 : index
      %16 = vector.load %arg5[%c0_14, %c0_15] : memref<8x128xf32, #tpu.memory_space<vmem>>, vector<8x128xf32>
      tpu.vector_store %arg5[%c0_14, %c0_15], %15 {strides = array<i32>} : memref<8x128xf32, #tpu.memory_space<vmem>>, vector<8x128xf32>,
    } else {
    }
    return
  }
  func.func @transform_0(%arg0: i32, %arg1: i32) -> (i32, i32) {
    %c0_i32 = arith.constant 0 : i32
    return %arg0, %arg1 : i32, i32
  }
  func.func @transform_1(%arg0: i32, %arg1: i32) -> (i32, i32) {
    %c0_i32 = arith.constant 0 : i32
    %c0_i32_0 = arith.constant 0 : i32
    return %arg1, %c0_i32 : i32, i32
  }
  func.func @transform_2(%arg0: i32, %arg1: i32) -> (i32, i32) {
    %c0_i32 = arith.constant 0 : i32
    %c0_i32_0 = arith.constant 0 : i32
    %c0_i32_1 = arith.constant 0 : i32
    return %c0_i32, %c0_i32_0 : i32, i32
  }
  func.func @transform_3(%arg0: i32, %arg1: i32) -> (i32, i32) {
    %c0_i32 = arith.constant 0 : i32
    %c0_i32_0 = arith.constant 0 : i32
    return %arg0, %c0_i32 : i32, i32
  }
}

</mosaic_0001>

<bundles_post_ra>
// kernel: tpu_custom_call.1
= control target key start
LH: loop header
LB: loop body
LE: loop exit
PB: predicated region body
PF: predicated region fallthrough
CT: control target
= control target key end

     0   :  { %8 = vsyncpa [#allocation4], 0  ;;  %s232_s0 = inlined_call_operand.hbm [shape: f32[8,32], index: 0, kind: input, shape index: {}]   ;;  %s233_s1 = inlined_call_operand.hbm [shape: f32[32,128], index: 1, kind: input, shape index: {}]   ;;  %s234_s2 = inlined_call_operand.vmem [shape: f32[1,128], index: 2, kind: input, shape index: {}]   ;;  %s235_s3 = inlined_call_operand.hbm [shape: f32[8,128], index: 3, kind: output, shape index: {}]  }
   0x1   :  { %9 = vsyncpa [#allocation7], 0 }
   0x2   :  { %10 = vsyncpa [#allocation5], 0  ;;  %s16_s14 = sshll.u32 %s232_s0, 4  ;;  %s195_s15 = smov [#allocation3]   ;;  %s17_s14 = int_to_ptr.hbm [resolvable:$true] %s16_s14 }
   0x3   :  { %s18_s16 = sshll.u32 %s195_s15, 4  ;;  %s26_s19 = sshll.u32 %s233_s1, 4  ;;  %s19_s16 = int_to_ptr.vmem [resolvable:$true] %s18_s16  ;;  %s27_s19 = int_to_ptr.hbm [resolvable:$true] %s26_s19 }
   0x4   :  { %21 = dma.hbm_to_vmem [thread:$0]  %s17_s14, 128, %s19_s16, [#allocation4]  }
   0x5   :  { %s196_s20 = smov [#allocation6]   ;;  %s197_s22 = smov 128  }
   0x6   :  { %s28_s21 = sshll.u32 %s196_s20, 4  ;;  %s198_s23 = smov 8   ;;  %s29_s21 = int_to_ptr.vmem [resolvable:$true] %s28_s21 }
   0x7   :  { %34 = dma.hbm_to_vmem [thread:$0]  %s27_s19, 512, %s29_s21, [#allocation7], %s197_s22, %s197_s22, %s198_s23  }
   0x8   :  { %189 = dma.done.wait [#allocation4], 128  }
   0x9   :  { %190 = vsyncadd [#allocation4], 4294967168 }
   0xa   :  { %191 = dma.done.wait [#allocation7], 512  }
   0xb   :  { %192 = vsyncadd [#allocation7], 4294966784  ;;  %v55_v0 = vld [vmem:[#allocation6 + $0x18] sm:$0xff]  ;;  %v54_v1 = vld [vmem:[#allocation6 + $0x10] sm:$0xff]  ;;  %vm56_vm0 = vcmask 261120   ;;  %s199_s24 = smov [#allocation8]  }
   0xc   :  { %72 = vmatpush.msra.mxu0 %v55_v0  ;;  %v53_v2 = vld [vmem:[#allocation6 + $0x8] sm:$0xff]  ;;  %v52_v3 = vld [vmem:[#allocation6] sm:$0xff]  ;;  %v51_v4 = vld [vmem:[#allocation3] sm:$0xff]  ;;  %s97_s25 = sshll.u32 %s199_s24, 4  ;;  %s99_s28 = sshll.u32 %s235_s3, 4  ;;  %s98_s25 = int_to_ptr.vmem [resolvable:$true] %s97_s25  ;;  %s100_s28 = int_to_ptr.hbm [resolvable:$true] %s99_s28 }
   0xd   :  { %v116_v5 = vld [vmem:[%s234_s2] ss:$0 sm:$0xff] }
   0xe   :  { %73 = vmatpush.msra.mxu0 %v54_v1 }
  0x10   :  { %74 = vmatpush.msra.mxu0 %v53_v2 }
  0x12   :  { %75 = vmatpush.msra.mxu0 %v52_v3 }
  0x13   :  { %110 = vmatmul.msk.f32.vlgmr.msra.gmra.mxu0 %vm56_vm0, %v51_v4 }
  0x90   :  { %v77_v6 = vpop.f32.mrf.mxu0 }
  0x91   :  { %v90_v7 = vadd.f32 %v116_v5, %v77_v6 }
  0x93   :  { %91 = vst [vmem:[#allocation8] sm:$0xff] %v90_v7 }
  0x94   :  { %102 = dma.vmem_to_hbm [thread:$0]  %s98_s25, 128, %s100_s28, [#allocation5]  }
  0x95   :  { %193 = dma.done.wait [#allocation5], 128  }
  0x96   :  { %194 = vsyncadd [#allocation5], 4294967168 }
  0x97   :  { %107 = vsyncpa [#allocation4], 1 }
  0x98   :  { %108 = vsyncpa [#allocation7], 1 }
  0x99   :  { %109 = vsyncpa [#allocation5], 1 }

</bundles_post_ra>
